<compile_context>
chip_gen: v7x
topology: tpu7x:2x2x1
jax: 0.10.0
libtpu: 0.0.40
codegen_flags: <defaults>
</compile_context>

<pallas_src>
import math
import jax
import jax.numpy as jnp
from jax import lax
from jax.experimental import pallas as pl
from jax.experimental.pallas import tpu as pltpu


D_MODEL = 32
N_HEAD = 4
SEQ = 8
BATCH = 2
LN_EPS = 1e-5


def _layernorm(v, g, b):
    # Single-pass mean/variance: E[x^2] - E[x]^2 (independent reductions).
    mu = jnp.mean(v, axis=-1, keepdims=True)
    var = jnp.mean(v * v, axis=-1, keepdims=True) - mu * mu
    return (v - mu) * lax.rsqrt(jnp.maximum(var, 0.0) + LN_EPS) * g + b


def _quick_gelu(v):
    return v * jax.nn.sigmoid(1.702 * v)


def residual_attention_block_kernel(
    x_ref,            # (L, D) f32  -- one sequence (batch-major grid)
    ln1_g, ln1_b,     # (1, D) f32
    w_qkv, b_qkv,     # (D, 3D) bf16, (1, 3D) f32
    w_out, b_out,     # (D, D)  bf16, (1, D)  f32
    ln2_g, ln2_b,     # (1, D) f32
    w_fc, b_fc,       # (D, 4D) bf16, (1, 4D) f32
    w_proj, b_proj,   # (4D, D) bf16, (1, D)  f32
    o_ref,            # (L, D) f32
):
    x = x_ref[...]
    L, D = x.shape
    H = N_HEAD
    Dh = D // H
    scale = 1.0 / math.sqrt(Dh)

    # ---- self-attention branch ----
    h = _layernorm(x, ln1_g[...], ln1_b[...])                       # f32
    qkv = jnp.dot(h.astype(jnp.bfloat16), w_qkv[...],
                  preferred_element_type=jnp.float32) + b_qkv[...]  # (L, 3D) f32

    q = qkv[:, :D] * scale          # 1/sqrt(Dh) applied in-kernel (one VPU mul)
    k = qkv[:, D:2 * D]
    v = qkv[:, 2 * D:]

    # Static head loop (H=4, unrolled at trace time). Per-sequence attention:
    # no mask needed. Scores contract last dims (no explicit transpose).
    ctx_heads = []
    for hd in range(H):
        q_h = q[:, hd * Dh:(hd + 1) * Dh]
        k_h = k[:, hd * Dh:(hd + 1) * Dh]
        v_h = v[:, hd * Dh:(hd + 1) * Dh]

        sc = lax.dot_general(q_h.astype(jnp.bfloat16), k_h.astype(jnp.bfloat16),
                             (((1,), (1,)), ((), ())),
                             preferred_element_type=jnp.float32)    # (L, L)
        sc = sc - jnp.max(sc, axis=-1, keepdims=True)               # f32 softmax
        e = jnp.exp(sc)
        inv = pl.reciprocal(jnp.sum(e, axis=-1, keepdims=True), approx=True)
        # Normalize AFTER the PV matmul: (L, Dh) multiply instead of (L, L).
        ctx = jnp.dot(e.astype(jnp.bfloat16), v_h.astype(jnp.bfloat16),
                      preferred_element_type=jnp.float32) * inv     # (L, Dh)
        ctx_heads.append(ctx)

    # Fused output projection: one (L,D)@(D,D) dot instead of 4 K=Dh matmuls.
    ctx_all = jnp.concatenate(ctx_heads, axis=-1)                   # (L, D)
    attn = jnp.dot(ctx_all.astype(jnp.bfloat16), w_out[...],
                   preferred_element_type=jnp.float32) + b_out[...]

    x = x + attn

    # ---- MLP branch ----
    h2 = _layernorm(x, ln2_g[...], ln2_b[...])
    f = jnp.dot(h2.astype(jnp.bfloat16), w_fc[...],
                preferred_element_type=jnp.float32) + b_fc[...]     # (L, 4D) f32
    f = _quick_gelu(f)                                              # f32 elementwise
    p = jnp.dot(f.astype(jnp.bfloat16), w_proj[...],
                preferred_element_type=jnp.float32) + b_proj[...]

    o_ref[...] = x + p


def residual_attention_block(x, params):
    """x: (L, N, D) float32 (seq, batch, d_model), PyTorch MHA layout.

    Returns (L, N, D).
    """
    L, N, D = x.shape

    # Batch-major view so attention is strictly per-sequence (no mask).
    xt = jnp.transpose(x, (1, 0, 2))   # (N, L, D)

    weight_args = [
        params["ln1_g"], params["ln1_b"],
        params["w_qkv"], params["b_qkv"],
        params["w_out"], params["b_out"],
        params["ln2_g"], params["ln2_b"],
        params["w_fc"], params["b_fc"],
        params["w_proj"], params["b_proj"],
    ]

    def const_spec(w):
        # Same block every grid step -> stays resident, one DMA total.
        return pl.BlockSpec(w.shape, lambda n: (0, 0))

    out = pl.pallas_call(
        residual_attention_block_kernel,
        out_shape=jax.ShapeDtypeStruct((N, L, D), jnp.float32),
        grid=(N,),
        in_specs=[pl.BlockSpec((None, L, D), lambda n: (n, 0, 0))]
                 + [const_spec(w) for w in weight_args],
        out_specs=pl.BlockSpec((None, L, D), lambda n: (n, 0, 0)),
        input_output_aliases={0: 0},   # reuse the activation buffer
        compiler_params=pltpu.CompilerParams(
            dimension_semantics=("parallel",)),   # v7x: shard batch over 2 TCs
    )(xt, *weight_args)

    return jnp.transpose(out, (1, 0, 2))


def init_params(key, d_model):
    """Weights stored bf16 (MXU-native), transposed (in, out); LN/bias in f32."""
    ks = jax.random.split(key, 8)
    s = 0.02
    D = d_model

    def w(k, shape):
        return (jax.random.normal(k, shape, jnp.float32) * s).astype(jnp.bfloat16)

    return {
        "ln1_g": jnp.ones((1, D), jnp.float32),
        "ln1_b": jnp.zeros((1, D), jnp.float32),
        "w_qkv": w(ks[0], (D, 3 * D)),
        "b_qkv": jax.random.normal(ks[1], (1, 3 * D), jnp.float32) * s,
        "w_out": w(ks[2], (D, D)),
        "b_out": jax.random.normal(ks[3], (1, D), jnp.float32) * s,
        "ln2_g": jnp.ones((1, D), jnp.float32),
        "ln2_b": jnp.zeros((1, D), jnp.float32),
        "w_fc": w(ks[4], (D, 4 * D)),
        "b_fc": jax.random.normal(ks[5], (1, 4 * D), jnp.float32) * s,
        "w_proj": w(ks[6], (4 * D, D)),
        "b_proj": jax.random.normal(ks[7], (1, D), jnp.float32) * s,
    }


def reference(x, p):
    """Pure-JAX f32 reference of the same forward pass (weights upcast exactly)."""
    L, N, D = x.shape
    H, Dh = N_HEAD, D // N_HEAD

    def ln(v, g, b):
        mu = v.mean(-1, keepdims=True)
        var = ((v - mu) ** 2).mean(-1, keepdims=True)
        return (v - mu) / jnp.sqrt(var + LN_EPS) * g + b

    w_qkv = p["w_qkv"].astype(jnp.float32)
    w_out = p["w_out"].astype(jnp.float32)
    w_fc = p["w_fc"].astype(jnp.float32)
    w_proj = p["w_proj"].astype(jnp.float32)

    h = ln(x, p["ln1_g"][0], p["ln1_b"][0])
    qkv = h @ w_qkv + p["b_qkv"][0]
    q, k, v = qkv[..., :D], qkv[..., D:2 * D], qkv[..., 2 * D:]

    def split_heads(t):  # (L, N, D) -> (N, H, L, Dh)
        return t.reshape(L, N, H, Dh).transpose(1, 2, 0, 3)

    qh, kh, vh = split_heads(q), split_heads(k), split_heads(v)
    sc = jnp.einsum("nhld,nhmd->nhlm", qh, kh) / math.sqrt(Dh)
    pr = jax.nn.softmax(sc, axis=-1)
    oh = jnp.einsum("nhlm,nhmd->nhld", pr, vh)       # (N, H, L, Dh)
    o = oh.transpose(2, 0, 1, 3).reshape(L, N, D)
    o = o @ w_out + p["b_out"][0]
    x = x + o

    h2 = ln(x, p["ln2_g"][0], p["ln2_b"][0])
    f = h2 @ w_fc + p["b_fc"][0]
    f = f * jax.nn.sigmoid(1.702 * f)
    proj = f @ w_proj + p["b_proj"][0]
    return x + proj


if __name__ == "__main__":
    key = jax.random.PRNGKey(0)
    kx, kp = jax.random.split(key)
    x = jax.random.normal(kx, (SEQ, BATCH, D_MODEL), jnp.float32)
    params = init_params(kp, D_MODEL)

    out = residual_attention_block(x, params)
    out = jax.block_until_ready(out)

    ref = reference(x, params)
    assert out.shape == (SEQ, BATCH, D_MODEL)
    err = float(jnp.max(jnp.abs(out - ref)))
    # Tolerance covers bf16 activation casts on the MXU path and the approx
    # softmax reciprocal (reference is pure f32).
    assert err < 2e-2, err

    print("KERNEL_OK")
</pallas_src>

<mosaic_0001>
module attributes {stable_mosaic.version = 11 : i64} {
  func.func @residual_attention_block_kernel(%arg0: i32, %arg1: memref<1x8x32xf32, #tpu.memory_space<vmem>>, %arg2: memref<1x32xf32, #tpu.memory_space<vmem>>, %arg3: memref<1x32xf32, #tpu.memory_space<vmem>>, %arg4: memref<32x96xbf16, #tpu.memory_space<vmem>>, %arg5: memref<1x96xf32, #tpu.memory_space<vmem>>, %arg6: memref<32x32xbf16, #tpu.memory_space<vmem>>, %arg7: memref<1x32xf32, #tpu.memory_space<vmem>>, %arg8: memref<1x32xf32, #tpu.memory_space<vmem>>, %arg9: memref<1x32xf32, #tpu.memory_space<vmem>>, %arg10: memref<32x128xbf16, #tpu.memory_space<vmem>>, %arg11: memref<1x128xf32, #tpu.memory_space<vmem>>, %arg12: memref<128x32xbf16, #tpu.memory_space<vmem>>, %arg13: memref<1x32xf32, #tpu.memory_space<vmem>>, %arg14: memref<1x8x32xf32, #tpu.memory_space<vmem>>) attributes {dimension_semantics = [#tpu.dimension_semantics<parallel>], iteration_bounds = array<i64: 2>, scalar_prefetch = 0 : i64, scratch_operands = 0 : i64, tpu.core_type = #tpu.core_type<tc>, window_params = [{transform_indices = @transform_0, window_bounds = array<i64: 1, 8, 32>}, {pipeline_mode = #tpu.pipeline_mode<synchronous>, transform_indices = @transform_1, window_bounds = array<i64: 1, 32>}, {pipeline_mode = #tpu.pipeline_mode<synchronous>, transform_indices = @transform_2, window_bounds = array<i64: 1, 32>}, {pipeline_mode = #tpu.pipeline_mode<synchronous>, transform_indices = @transform_3, window_bounds = array<i64: 32, 96>}, {pipeline_mode = #tpu.pipeline_mode<synchronous>, transform_indices = @transform_4, window_bounds = array<i64: 1, 96>}, {pipeline_mode = #tpu.pipeline_mode<synchronous>, transform_indices = @transform_5, window_bounds = array<i64: 32, 32>}, {pipeline_mode = #tpu.pipeline_mode<synchronous>, transform_indices = @transform_6, window_bounds = array<i64: 1, 32>}, {pipeline_mode = #tpu.pipeline_mode<synchronous>, transform_indices = @transform_7, window_bounds = array<i64: 1, 32>}, {pipeline_mode = #tpu.pipeline_mode<synchronous>, transform_indices = @transform_8, window_bounds = array<i64: 1, 32>}, {pipeline_mode = #tpu.pipeline_mode<synchronous>, transform_indices = @transform_9, window_bounds = array<i64: 32, 128>}, {pipeline_mode = #tpu.pipeline_mode<synchronous>, transform_indices = @transform_10, window_bounds = array<i64: 1, 128>}, {pipeline_mode = #tpu.pipeline_mode<synchronous>, transform_indices = @transform_11, window_bounds = array<i64: 128, 32>}, {pipeline_mode = #tpu.pipeline_mode<synchronous>, transform_indices = @transform_12, window_bounds = array<i64: 1, 32>}, {transform_indices = @transform_13, window_bounds = array<i64: 1, 8, 32>}]} {
    %c0 = arith.constant 0 : index
    %c0_0 = arith.constant 0 : index
    %c0_1 = arith.constant 0 : index
    %0 = vector.load %arg1[%c0, %c0_0, %c0_1] : memref<1x8x32xf32, #tpu.memory_space<vmem>>, vector<1x8x32xf32>
    %1 = vector.shape_cast %0 : vector<1x8x32xf32> to vector<8x32xf32>
    %c0_2 = arith.constant 0 : index
    %c0_3 = arith.constant 0 : index
    %2 = vector.load %arg2[%c0_2, %c0_3] : memref<1x32xf32, #tpu.memory_space<vmem>>, vector<1x32xf32>
    %c0_4 = arith.constant 0 : index
    %c0_5 = arith.constant 0 : index
    %3 = vector.load %arg3[%c0_4, %c0_5] : memref<1x32xf32, #tpu.memory_space<vmem>>, vector<1x32xf32>
    %cst = arith.constant dense<0.000000e+00> : vector<8xf32>
    %4 = vector.multi_reduction <add>, %1, %cst [1] : vector<8x32xf32> to vector<8xf32>
    %5 = vector.shape_cast %4 : vector<8xf32> to vector<8x1xf32>
    %cst_6 = arith.constant 3.200000e+01 : f32
    %6 = vector.broadcast %cst_6 : f32 to vector<8x1xf32>
    %7 = arith.divf %5, %6 : vector<8x1xf32>
    %8 = arith.mulf %1, %1 : vector<8x32xf32>
    %cst_7 = arith.constant dense<0.000000e+00> : vector<8xf32>
    %9 = vector.multi_reduction <add>, %8, %cst_7 [1] : vector<8x32xf32> to vector<8xf32>
    %10 = vector.shape_cast %9 : vector<8xf32> to vector<8x1xf32>
    %cst_8 = arith.constant 3.200000e+01 : f32
    %11 = vector.broadcast %cst_8 : f32 to vector<8x1xf32>
    %12 = arith.divf %10, %11 : vector<8x1xf32>
    %13 = arith.mulf %7, %7 : vector<8x1xf32>
    %14 = arith.subf %12, %13 : vector<8x1xf32>
    %15 = vector.broadcast %7 : vector<8x1xf32> to vector<8x32xf32>
    %16 = arith.subf %1, %15 : vector<8x32xf32>
    %cst_9 = arith.constant 0.000000e+00 : f32
    %17 = vector.broadcast %cst_9 : f32 to vector<8x1xf32>
    %18 = arith.maximumf %14, %17 : vector<8x1xf32>
    %cst_10 = arith.constant 9.99999974E-6 : f32
    %19 = vector.broadcast %cst_10 : f32 to vector<8x1xf32>
    %20 = arith.addf %18, %19 : vector<8x1xf32>
    %21 = math.rsqrt %20 : vector<8x1xf32>
    %22 = vector.broadcast %21 : vector<8x1xf32> to vector<8x32xf32>
    %23 = arith.mulf %16, %22 : vector<8x32xf32>
    %24 = vector.broadcast %2 : vector<1x32xf32> to vector<8x32xf32>
    %25 = arith.mulf %23, %24 : vector<8x32xf32>
    %26 = vector.broadcast %3 : vector<1x32xf32> to vector<8x32xf32>
    %27 = arith.addf %25, %26 : vector<8x32xf32>
    %28 = arith.truncf %27 : vector<8x32xf32> to vector<8x32xbf16>
    %c0_11 = arith.constant 0 : index
    %c0_12 = arith.constant 0 : index
    %29 = vector.load %arg4[%c0_11, %c0_12] : memref<32x96xbf16, #tpu.memory_space<vmem>>, vector<32x96xbf16>
    %cst_13 = arith.constant dense<0.000000e+00> : vector<8x96xf32>
    %30 = tpu.matmul %28, %29, %cst_13 {dimension_numbers = #tpu.dot_dimension_numbers<[1], [0], [0], [1], [0, 0, 1, 1], [], []>} : vector<8x32xbf16>, vector<32x96xbf16>, vector<8x96xf32> -> vector<8x96xf32>
    %c0_14 = arith.constant 0 : index
    %c0_15 = arith.constant 0 : index
    %31 = vector.load %arg5[%c0_14, %c0_15] : memref<1x96xf32, #tpu.memory_space<vmem>>, vector<1x96xf32>
    %32 = vector.broadcast %31 : vector<1x96xf32> to vector<8x96xf32>
    %33 = arith.addf %30, %32 : vector<8x96xf32>
    %34 = vector.extract_strided_slice %33 {offsets = [0, 0], sizes = [8, 32], strides = [1, 1]} : vector<8x96xf32> to vector<8x32xf32>
    %cst_16 = arith.constant 0.353553385 : f32
    %35 = vector.broadcast %cst_16 : f32 to vector<8x32xf32>
    %36 = arith.mulf %34, %35 : vector<8x32xf32>
    %37 = vector.extract_strided_slice %33 {offsets = [0, 32], sizes = [8, 32], strides = [1, 1]} : vector<8x96xf32> to vector<8x32xf32>
    %38 = vector.extract_strided_slice %33 {offsets = [0, 64], sizes = [8, 32], strides = [1, 1]} : vector<8x96xf32> to vector<8x32xf32>
    %39 = vector.extract_strided_slice %36 {offsets = [0, 0], sizes = [8, 8], strides = [1, 1]} : vector<8x32xf32> to vector<8x8xf32>
    %40 = vector.extract_strided_slice %37 {offsets = [0, 0], sizes = [8, 8], strides = [1, 1]} : vector<8x32xf32> to vector<8x8xf32>
    %41 = vector.extract_strided_slice %38 {offsets = [0, 0], sizes = [8, 8], strides = [1, 1]} : vector<8x32xf32> to vector<8x8xf32>
    %42 = arith.truncf %39 : vector<8x8xf32> to vector<8x8xbf16>
    %43 = arith.truncf %40 : vector<8x8xf32> to vector<8x8xbf16>
    %cst_17 = arith.constant dense<0.000000e+00> : vector<8x8xf32>
    %44 = tpu.matmul %42, %43, %cst_17 {dimension_numbers = #tpu.dot_dimension_numbers<[1], [1], [0], [0], [0, 0, 1, 0], [], []>} : vector<8x8xbf16>, vector<8x8xbf16>, vector<8x8xf32> -> vector<8x8xf32>
    %cst_18 = arith.constant dense<0xFF800000> : vector<8xf32>
    %45 = vector.multi_reduction <maximumf>, %44, %cst_18 [1] : vector<8x8xf32> to vector<8xf32>
    %46 = vector.shape_cast %45 : vector<8xf32> to vector<8x1xf32>
    %47 = vector.broadcast %46 : vector<8x1xf32> to vector<8x8xf32>
    %48 = arith.subf %44, %47 : vector<8x8xf32>
    %49 = math.exp %48 : vector<8x8xf32>
    %cst_19 = arith.constant dense<0.000000e+00> : vector<8xf32>
    %50 = vector.multi_reduction <add>, %49, %cst_19 [1] : vector<8x8xf32> to vector<8xf32>
    %51 = vector.shape_cast %50 : vector<8xf32> to vector<8x1xf32>
    %52 = tpu.reciprocal %51 {approx = true} : vector<8x1xf32> -> vector<8x1xf32>
    %53 = arith.truncf %49 : vector<8x8xf32> to vector<8x8xbf16>
    %54 = arith.truncf %41 : vector<8x8xf32> to vector<8x8xbf16>
    %cst_20 = arith.constant dense<0.000000e+00> : vector<8x8xf32>
    %55 = tpu.matmul %53, %54, %cst_20 {dimension_numbers = #tpu.dot_dimension_numbers<[1], [0], [0], [1], [0, 0, 1, 1], [], []>} : vector<8x8xbf16>, vector<8x8xbf16>, vector<8x8xf32> -> vector<8x8xf32>
    %56 = vector.broadcast %52 : vector<8x1xf32> to vector<8x8xf32>
    %57 = arith.mulf %55, %56 : vector<8x8xf32>
    %58 = vector.extract_strided_slice %36 {offsets = [0, 8], sizes = [8, 8], strides = [1, 1]} : vector<8x32xf32> to vector<8x8xf32>
    %59 = vector.extract_strided_slice %37 {offsets = [0, 8], sizes = [8, 8], strides = [1, 1]} : vector<8x32xf32> to vector<8x8xf32>
    %60 = vector.extract_strided_slice %38 {offsets = [0, 8], sizes = [8, 8], strides = [1, 1]} : vector<8x32xf32> to vector<8x8xf32>
    %61 = arith.truncf %58 : vector<8x8xf32> to vector<8x8xbf16>
    %62 = arith.truncf %59 : vector<8x8xf32> to vector<8x8xbf16>
    %cst_21 = arith.constant dense<0.000000e+00> : vector<8x8xf32>
    %63 = tpu.matmul %61, %62, %cst_21 {dimension_numbers = #tpu.dot_dimension_numbers<[1], [1], [0], [0], [0, 0, 1, 0], [], []>} : vector<8x8xbf16>, vector<8x8xbf16>, vector<8x8xf32> -> vector<8x8xf32>
    %cst_22 = arith.constant dense<0xFF800000> : vector<8xf32>
    %64 = vector.multi_reduction <maximumf>, %63, %cst_22 [1] : vector<8x8xf32> to vector<8xf32>
    %65 = vector.shape_cast %64 : vector<8xf32> to vector<8x1xf32>
    %66 = vector.broadcast %65 : vector<8x1xf32> to vector<8x8xf32>
    %67 = arith.subf %63, %66 : vector<8x8xf32>
    %68 = math.exp %67 : vector<8x8xf32>
    %cst_23 = arith.constant dense<0.000000e+00> : vector<8xf32>
    %69 = vector.multi_reduction <add>, %68, %cst_23 [1] : vector<8x8xf32> to vector<8xf32>
    %70 = vector.shape_cast %69 : vector<8xf32> to vector<8x1xf32>
    %71 = tpu.reciprocal %70 {approx = true} : vector<8x1xf32> -> vector<8x1xf32>
    %72 = arith.truncf %68 : vector<8x8xf32> to vector<8x8xbf16>
    %73 = arith.truncf %60 : vector<8x8xf32> to vector<8x8xbf16>
    %cst_24 = arith.constant dense<0.000000e+00> : vector<8x8xf32>
    %74 = tpu.matmul %72, %73, %cst_24 {dimension_numbers = #tpu.dot_dimension_numbers<[1], [0], [0], [1], [0, 0, 1, 1], [], []>} : vector<8x8xbf16>, vector<8x8xbf16>, vector<8x8xf32> -> vector<8x8xf32>
    %75 = vector.broadcast %71 : vector<8x1xf32> to vector<8x8xf32>
    %76 = arith.mulf %74, %75 : vector<8x8xf32>
    %77 = vector.extract_strided_slice %36 {offsets = [0, 16], sizes = [8, 8], strides = [1, 1]} : vector<8x32xf32> to vector<8x8xf32>
    %78 = vector.extract_strided_slice %37 {offsets = [0, 16], sizes = [8, 8], strides = [1, 1]} : vector<8x32xf32> to vector<8x8xf32>
    %79 = vector.extract_strided_slice %38 {offsets = [0, 16], sizes = [8, 8], strides = [1, 1]} : vector<8x32xf32> to vector<8x8xf32>
    %80 = arith.truncf %77 : vector<8x8xf32> to vector<8x8xbf16>
    %81 = arith.truncf %78 : vector<8x8xf32> to vector<8x8xbf16>
    %cst_25 = arith.constant dense<0.000000e+00> : vector<8x8xf32>
    %82 = tpu.matmul %80, %81, %cst_25 {dimension_numbers = #tpu.dot_dimension_numbers<[1], [1], [0], [0], [0, 0, 1, 0], [], []>} : vector<8x8xbf16>, vector<8x8xbf16>, vector<8x8xf32> -> vector<8x8xf32>
    %cst_26 = arith.constant dense<0xFF800000> : vector<8xf32>
    %83 = vector.multi_reduction <maximumf>, %82, %cst_26 [1] : vector<8x8xf32> to vector<8xf32>
    %84 = vector.shape_cast %83 : vector<8xf32> to vector<8x1xf32>
    %85 = vector.broadcast %84 : vector<8x1xf32> to vector<8x8xf32>
    %86 = arith.subf %82, %85 : vector<8x8xf32>
    %87 = math.exp %86 : vector<8x8xf32>
    %cst_27 = arith.constant dense<0.000000e+00> : vector<8xf32>
    %88 = vector.multi_reduction <add>, %87, %cst_27 [1] : vector<8x8xf32> to vector<8xf32>
    %89 = vector.shape_cast %88 : vector<8xf32> to vector<8x1xf32>
    %90 = tpu.reciprocal %89 {approx = true} : vector<8x1xf32> -> vector<8x1xf32>
    %91 = arith.truncf %87 : vector<8x8xf32> to vector<8x8xbf16>
    %92 = arith.truncf %79 : vector<8x8xf32> to vector<8x8xbf16>
    %cst_28 = arith.constant dense<0.000000e+00> : vector<8x8xf32>
    %93 = tpu.matmul %91, %92, %cst_28 {dimension_numbers = #tpu.dot_dimension_numbers<[1], [0], [0], [1], [0, 0, 1, 1], [], []>} : vector<8x8xbf16>, vector<8x8xbf16>, vector<8x8xf32> -> vector<8x8xf32>
    %94 = vector.broadcast %90 : vector<8x1xf32> to vector<8x8xf32>
    %95 = arith.mulf %93, %94 : vector<8x8xf32>
    %96 = vector.extract_strided_slice %36 {offsets = [0, 24], sizes = [8, 8], strides = [1, 1]} : vector<8x32xf32> to vector<8x8xf32>
    %97 = vector.extract_strided_slice %37 {offsets = [0, 24], sizes = [8, 8], strides = [1, 1]} : vector<8x32xf32> to vector<8x8xf32>
    %98 = vector.extract_strided_slice %38 {offsets = [0, 24], sizes = [8, 8], strides = [1, 1]} : vector<8x32xf32> to vector<8x8xf32>
    %99 = arith.truncf %96 : vector<8x8xf32> to vector<8x8xbf16>
    %100 = arith.truncf %97 : vector<8x8xf32> to vector<8x8xbf16>
    %cst_29 = arith.constant dense<0.000000e+00> : vector<8x8xf32>
    %101 = tpu.matmul %99, %100, %cst_29 {dimension_numbers = #tpu.dot_dimension_numbers<[1], [1], [0], [0], [0, 0, 1, 0], [], []>} : vector<8x8xbf16>, vector<8x8xbf16>, vector<8x8xf32> -> vector<8x8xf32>
    %cst_30 = arith.constant dense<0xFF800000> : vector<8xf32>
    %102 = vector.multi_reduction <maximumf>, %101, %cst_30 [1] : vector<8x8xf32> to vector<8xf32>
    %103 = vector.shape_cast %102 : vector<8xf32> to vector<8x1xf32>
    %104 = vector.broadcast %103 : vector<8x1xf32> to vector<8x8xf32>
    %105 = arith.subf %101, %104 : vector<8x8xf32>
    %106 = math.exp %105 : vector<8x8xf32>
    %cst_31 = arith.constant dense<0.000000e+00> : vector<8xf32>
    %107 = vector.multi_reduction <add>, %106, %cst_31 [1] : vector<8x8xf32> to vector<8xf32>
    %108 = vector.shape_cast %107 : vector<8xf32> to vector<8x1xf32>
    %109 = tpu.reciprocal %108 {approx = true} : vector<8x1xf32> -> vector<8x1xf32>
    %110 = arith.truncf %106 : vector<8x8xf32> to vector<8x8xbf16>
    %111 = arith.truncf %98 : vector<8x8xf32> to vector<8x8xbf16>
    %cst_32 = arith.constant dense<0.000000e+00> : vector<8x8xf32>
    %112 = tpu.matmul %110, %111, %cst_32 {dimension_numbers = #tpu.dot_dimension_numbers<[1], [0], [0], [1], [0, 0, 1, 1], [], []>} : vector<8x8xbf16>, vector<8x8xbf16>, vector<8x8xf32> -> vector<8x8xf32>
    %113 = vector.broadcast %109 : vector<8x1xf32> to vector<8x8xf32>
    %114 = arith.mulf %112, %113 : vector<8x8xf32>
    %115 = tpu.concatenate %57, %76, %95, %114 in 1 : vector<8x8xf32>, vector<8x8xf32>, vector<8x8xf32>, vector<8x8xf32> -> vector<8x32xf32>
    %116 = arith.truncf %115 : vector<8x32xf32> to vector<8x32xbf16>
    %c0_33 = arith.constant 0 : index
    %c0_34 = arith.constant 0 : index
    %117 = vector.load %arg6[%c0_33, %c0_34] : memref<32x32xbf16, #tpu.memory_space<vmem>>, vector<32x32xbf16>
    %cst_35 = arith.constant dense<0.000000e+00> : vector<8x32xf32>
    %118 = tpu.matmul %116, %117, %cst_35 {dimension_numbers = #tpu.dot_dimension_numbers<[1], [0], [0], [1], [0, 0, 1, 1], [], []>} : vector<8x32xbf16>, vector<32x32xbf16>, vector<8x32xf32> -> vector<8x32xf32>
    %c0_36 = arith.constant 0 : index
    %c0_37 = arith.constant 0 : index
    %119 = vector.load %arg7[%c0_36, %c0_37] : memref<1x32xf32, #tpu.memory_space<vmem>>, vector<1x32xf32>
    %120 = vector.broadcast %119 : vector<1x32xf32> to vector<8x32xf32>
    %121 = arith.addf %118, %120 : vector<8x32xf32>
    %122 = arith.addf %1, %121 : vector<8x32xf32>
    %c0_38 = arith.constant 0 : index
    %c0_39 = arith.constant 0 : index
    %123 = vector.load %arg8[%c0_38, %c0_39] : memref<1x32xf32, #tpu.memory_space<vmem>>, vector<1x32xf32>
    %c0_40 = arith.constant 0 : index
    %c0_41 = arith.constant 0 : index
    %124 = vector.load %arg9[%c0_40, %c0_41] : memref<1x32xf32, #tpu.memory_space<vmem>>, vector<1x32xf32>
    %cst_42 = arith.constant dense<0.000000e+00> : vector<8xf32>
    %125 = vector.multi_reduction <add>, %122, %cst_42 [1] : vector<8x32xf32> to vector<8xf32>
    %126 = vector.shape_cast %125 : vector<8xf32> to vector<8x1xf32>
    %cst_43 = arith.constant 3.200000e+01 : f32
    %127 = vector.broadcast %cst_43 : f32 to vector<8x1xf32>
    %128 = arith.divf %126, %127 : vector<8x1xf32>
    %129 = arith.mulf %122, %122 : vector<8x32xf32>
    %cst_44 = arith.constant dense<0.000000e+00> : vector<8xf32>
    %130 = vector.multi_reduction <add>, %129, %cst_44 [1] : vector<8x32xf32> to vector<8xf32>
    %131 = vector.shape_cast %130 : vector<8xf32> to vector<8x1xf32>
    %cst_45 = arith.constant 3.200000e+01 : f32
    %132 = vector.broadcast %cst_45 : f32 to vector<8x1xf32>
    %133 = arith.divf %131, %132 : vector<8x1xf32>
    %134 = arith.mulf %128, %128 : vector<8x1xf32>
    %135 = arith.subf %133, %134 : vector<8x1xf32>
    %136 = vector.broadcast %128 : vector<8x1xf32> to vector<8x32xf32>
    %137 = arith.subf %122, %136 : vector<8x32xf32>
    %cst_46 = arith.constant 0.000000e+00 : f32
    %138 = vector.broadcast %cst_46 : f32 to vector<8x1xf32>
    %139 = arith.maximumf %135, %138 : vector<8x1xf32>
    %cst_47 = arith.constant 9.99999974E-6 : f32
    %140 = vector.broadcast %cst_47 : f32 to vector<8x1xf32>
    %141 = arith.addf %139, %140 : vector<8x1xf32>
    %142 = math.rsqrt %141 : vector<8x1xf32>
    %143 = vector.broadcast %142 : vector<8x1xf32> to vector<8x32xf32>
    %144 = arith.mulf %137, %143 : vector<8x32xf32>
    %145 = vector.broadcast %123 : vector<1x32xf32> to vector<8x32xf32>
    %146 = arith.mulf %144, %145 : vector<8x32xf32>
    %147 = vector.broadcast %124 : vector<1x32xf32> to vector<8x32xf32>
    %148 = arith.addf %146, %147 : vector<8x32xf32>
    %149 = arith.truncf %148 : vector<8x32xf32> to vector<8x32xbf16>
    %c0_48 = arith.constant 0 : index
    %c0_49 = arith.constant 0 : index
    %150 = vector.load %arg10[%c0_48, %c0_49] : memref<32x128xbf16, #tpu.memory_space<vmem>>, vector<32x128xbf16>
    %cst_50 = arith.constant dense<0.000000e+00> : vector<8x128xf32>
    %151 = tpu.matmul %149, %150, %cst_50 {dimension_numbers = #tpu.dot_dimension_numbers<[1], [0], [0], [1], [0, 0, 1, 1], [], []>} : vector<8x32xbf16>, vector<32x128xbf16>, vector<8x128xf32> -> vector<8x128xf32>
    %c0_51 = arith.constant 0 : index
    %c0_52 = arith.constant 0 : index
    %152 = vector.load %arg11[%c0_51, %c0_52] : memref<1x128xf32, #tpu.memory_space<vmem>>, vector<1x128xf32>
    %153 = vector.broadcast %152 : vector<1x128xf32> to vector<8x128xf32>
    %154 = arith.addf %151, %153 : vector<8x128xf32>
    %cst_53 = arith.constant 1.702000e+00 : f32
    %155 = vector.broadcast %cst_53 : f32 to vector<8x128xf32>
    %156 = arith.mulf %155, %154 : vector<8x128xf32>
    %157 = arith.negf %156 : vector<8x128xf32>
    %158 = math.exp %157 : vector<8x128xf32>
    %cst_54 = arith.constant 1.000000e+00 : f32
    %159 = vector.broadcast %cst_54 : f32 to vector<8x128xf32>
    %160 = arith.addf %159, %158 : vector<8x128xf32>
    %161 = arith.divf %159, %160 : vector<8x128xf32>
    %162 = arith.mulf %154, %161 : vector<8x128xf32>
    %163 = arith.truncf %162 : vector<8x128xf32> to vector<8x128xbf16>
    %c0_55 = arith.constant 0 : index
    %c0_56 = arith.constant 0 : index
    %164 = vector.load %arg12[%c0_55, %c0_56] : memref<128x32xbf16, #tpu.memory_space<vmem>>, vector<128x32xbf16>
    %cst_57 = arith.constant dense<0.000000e+00> : vector<8x32xf32>
    %165 = tpu.matmul %163, %164, %cst_57 {dimension_numbers = #tpu.dot_dimension_numbers<[1], [0], [0], [1], [0, 0, 1, 1], [], []>} : vector<8x128xbf16>, vector<128x32xbf16>, vector<8x32xf32> -> vector<8x32xf32>
    %c0_58 = arith.constant 0 : index
    %c0_59 = arith.constant 0 : index
    %166 = vector.load %arg13[%c0_58, %c0_59] : memref<1x32xf32, #tpu.memory_space<vmem>>, vector<1x32xf32>
    %167 = vector.broadcast %166 : vector<1x32xf32> to vector<8x32xf32>
    %168 = arith.addf %165, %167 : vector<8x32xf32>
    %169 = arith.addf %122, %168 : vector<8x32xf32>
    %c0_60 = arith.constant 0 : index
    %c0_61 = arith.constant 0 : index
    %c0_62 = arith.constant 0 : index
    %170 = vector.load %arg14[%c0_60, %c0_61, %c0_62] : memref<1x8x32xf32, #tpu.memory_space<vmem>>, vector<1x8x32xf32>
    %171 = vector.shape_cast %170 : vector<1x8x32xf32> to vector<8x32xf32>
    %172 = vector.shape_cast %169 : vector<8x32xf32> to vector<1x8x32xf32>
    tpu.vector_store %arg14[%c0_60, %c0_61, %c0_62], %172 {strides = array<i32>} : memref<1x8x32xf32, #tpu.memory_space<vmem>>, vector<1x8x32xf32>,
    return
  }
  func.func @transform_0(%arg0: i32) -> (i32, i32, i32) {
    %c0_i32 = arith.constant 0 : i32
    %c0_i32_0 = arith.constant 0 : i32
    %c0_i32_1 = arith.constant 0 : i32
    return %arg0, %c0_i32, %c0_i32_0 : i32, i32, i32
  }
  func.func @transform_1(%arg0: i32) -> (i32, i32) {
    %c0_i32 = arith.constant 0 : i32
    %c0_i32_0 = arith.constant 0 : i32
    %c0_i32_1 = arith.constant 0 : i32
    return %c0_i32, %c0_i32_0 : i32, i32
  }
  func.func @transform_2(%arg0: i32) -> (i32, i32) {
    %c0_i32 = arith.constant 0 : i32
    %c0_i32_0 = arith.constant 0 : i32
    %c0_i32_1 = arith.constant 0 : i32
    return %c0_i32, %c0_i32_0 : i32, i32
  }
  func.func @transform_3(%arg0: i32) -> (i32, i32) {
    %c0_i32 = arith.constant 0 : i32
    %c0_i32_0 = arith.constant 0 : i32
    %c0_i32_1 = arith.constant 0 : i32
    return %c0_i32, %c0_i32_0 : i32, i32
  }
  func.func @transform_4(%arg0: i32) -> (i32, i32) {
    %c0_i32 = arith.constant 0 : i32
    %c0_i32_0 = arith.constant 0 : i32
    %c0_i32_1 = arith.constant 0 : i32
    return %c0_i32, %c0_i32_0 : i32, i32
  }
  func.func @transform_5(%arg0: i32) -> (i32, i32) {
    %c0_i32 = arith.constant 0 : i32
    %c0_i32_0 = arith.constant 0 : i32
    %c0_i32_1 = arith.constant 0 : i32
    return %c0_i32, %c0_i32_0 : i32, i32
  }
  func.func @transform_6(%arg0: i32) -> (i32, i32) {
    %c0_i32 = arith.constant 0 : i32
    %c0_i32_0 = arith.constant 0 : i32
    %c0_i32_1 = arith.constant 0 : i32
    return %c0_i32, %c0_i32_0 : i32, i32
  }
  func.func @transform_7(%arg0: i32) -> (i32, i32) {
    %c0_i32 = arith.constant 0 : i32
    %c0_i32_0 = arith.constant 0 : i32
    %c0_i32_1 = arith.constant 0 : i32
    return %c0_i32, %c0_i32_0 : i32, i32
  }
  func.func @transform_8(%arg0: i32) -> (i32, i32) {
    %c0_i32 = arith.constant 0 : i32
    %c0_i32_0 = arith.constant 0 : i32
    %c0_i32_1 = arith.constant 0 : i32
    return %c0_i32, %c0_i32_0 : i32, i32
  }
  func.func @transform_9(%arg0: i32) -> (i32, i32) {
    %c0_i32 = arith.constant 0 : i32
    %c0_i32_0 = arith.constant 0 : i32
    %c0_i32_1 = arith.constant 0 : i32
    return %c0_i32, %c0_i32_0 : i32, i32
  }
  func.func @transform_10(%arg0: i32) -> (i32, i32) {
    %c0_i32 = arith.constant 0 : i32
    %c0_i32_0 = arith.constant 0 : i32
    %c0_i32_1 = arith.constant 0 : i32
    return %c0_i32, %c0_i32_0 : i32, i32
  }
  func.func @transform_11(%arg0: i32) -> (i32, i32) {
    %c0_i32 = arith.constant 0 : i32
    %c0_i32_0 = arith.constant 0 : i32
    %c0_i32_1 = arith.constant 0 : i32
    return %c0_i32, %c0_i32_0 : i32, i32
  }
  func.func @transform_12(%arg0: i32) -> (i32, i32) {
    %c0_i32 = arith.constant 0 : i32
    %c0_i32_0 = arith.constant 0 : i32
    %c0_i32_1 = arith.constant 0 : i32
    return %c0_i32, %c0_i32_0 : i32, i32
  }
  func.func @transform_13(%arg0: i32) -> (i32, i32, i32) {
    %c0_i32 = arith.constant 0 : i32
    %c0_i32_0 = arith.constant 0 : i32
    %c0_i32_1 = arith.constant 0 : i32
    return %arg0, %c0_i32, %c0_i32_0 : i32, i32, i32
  }
}

</mosaic_0001>

<bundles_post_ra>
// kernel: tpu_custom_call.1
= control target key start
LH: loop header
LB: loop body
LE: loop exit
PB: predicated region body
PF: predicated region fallthrough
CT: control target
= control target key end

     0   :  { %18 = vsyncpa [#allocation3], 0  ;;  %s2186_s0 = inlined_call_operand.hbm [shape: f32[2,8,32], index: 0, kind: input, shape index: {}, may-alias: {0,13}]   ;;  %s2187_s1 = inlined_call_operand.vmem [shape: f32[1,32], index: 1, kind: input, shape index: {}]   ;;  %s2188_s2 = inlined_call_operand.vmem [shape: f32[1,32], index: 2, kind: input, shape index: {}]   ;;  %s2189_s3 = inlined_call_operand.vmem [shape: bf16[32,96], index: 3, kind: input, shape index: {}]   ;;  %s2190_s4 = inlined_call_operand.vmem [shape: f32[1,96], index: 4, kind: input, shape index: {}]   ;;  %s2191_s5 = inlined_call_operand.vmem [shape: bf16[32,32], index: 5, kind: input, shape index: {}]   ;;  %s2192_s6 = inlined_call_operand.vmem [shape: f32[1,32], index: 6, kind: input, shape index: {}]   ;;  %s2193_s7 = inlined_call_operand.vmem [shape: f32[1,32], index: 7, kind: input, shape index: {}]   ;;  %s2194_s8 = inlined_call_operand.vmem [shape: f32[1,32], index: 8, kind: input, shape index: {}]   ;;  %s2195_s9 = inlined_call_operand.vmem [shape: bf16[32,128], index: 9, kind: input, shape index: {}]   ;;  %s2196_s10 = inlined_call_operand.vmem [shape: f32[1,128], index: 10, kind: input, shape index: {}]   ;;  %s2197_s11 = inlined_call_operand.vmem [shape: bf16[128,32], index: 11, kind: input, shape index: {}]   ;;  %s2198_s12 = inlined_call_operand.vmem [shape: f32[1,32], index: 12, kind: input, shape index: {}]   ;;  %s2199_s13 = inlined_call_operand.hbm [shape: f32[2,8,32], index: 13, kind: output, shape index: {}, may-alias: {0,13}]  }
   0x1   :  { %20 = vsyncpa [#allocation3 + $0x1], 0 }
   0x2   :  { %21 = vsyncpa [#allocation4], 0 }
   0x3   :  { %23 = vsyncpa [#allocation4 + $0x1], 0  ;;  %s1852_s25 = smov 0   ;;  %s1854_s26 = smov 0  }
   0x4   :  { %s1856_s27 = smov 0   ;;  %s1858_s28 = smov 0  }
   0x5 LB: > { %2205 = sst [smem:[#allocation8_spill]] %s1750_s25  ;;  %s1873_s29 = sadd.s32 4294967295, %s1762_s28   ;;  %s1762_s28 = sphi %s1858_s28, %s2220_s28   ;;  %s1758_s27 = sphi %s1856_s27, %s2222_s27   ;;  %s1754_s26 = sphi %s1854_s26, %s2224_s26   ;;  %s1750_s25 = sphi %s1852_s25, %s2223_s25  }
   0x6   : > { %2206 = sst [smem:[#allocation9_spill]] %s1758_s27  ;;  %s1394_s30 = sadd.s32 4294967294, %s1762_s28  }
   0x7   : > { %s1877_s14 = sadd.s32 1, %s1762_s28   ;;  %s36_s15 = sadd.s32 1, %s1758_s27 }
   0x8   : > { %2207 = sst [smem:[#allocation10_spill]] %s1877_s14  ;;  %s33_s16 = ssub.s32 %s1762_s28, %s1877_s14 }
   0x9   : > { %p43_p0 = scmp.ne.s32.totalorder %s1758_s27, %s1754_s26  ;;  %p34_p1 = scmp.eq.s32.totalorder %s33_s16, 0 }
   0xa   : > { %p44_p2 = scmp.eq.s32.totalorder %s1762_s28, 0  ;;  %p49_p3 = scmp.ne.s32.totalorder %s1754_s26, %s1750_s25 }
   0xb   : > { %p50_p4 = scmp.eq.s32.totalorder %s1873_s29, 0  ;;  %p325_p7 = scmp.eq.s32.totalorder %s1873_s29, 1 }
   0xc   : > { %s1889_s17 = scalar_select %p34_p1, %s1758_s27, %s36_s15  }
   0xd   : > { %p1891_p5 = por %p44_p2, %p43_p0  ;;  %p1895_p6 = por %p50_p4, %p49_p3 }
   0xe   : > { %2208 = sst [smem:[#allocation11_spill]] %s1889_s17  ;;  %p331_p8 = scmp.eq.s32.totalorder %s1394_s30, 1 }
   0xf   : > { %p1578_p10 = scmp.lt.s32.totalorder %s1762_s28, 2  ;;  %p1902_p11 = por %p325_p7, %p43_p0 }
  0x10   : > { %p1906_p12 = por %p331_p8, %p49_p3  ;;  %s387_s22 = sand.u32 1, %s1758_s27  }
  0x11   : > { %s2211_s20 = scalar_select %p1902_p11, 1, 0 }
  0x12   : > { %s2212_s21 = scalar_select %p1906_p12, 1, 0 }
  0x13   : > { %s1398_s23 = sshll.u32 %s1762_s28, 7  ;;  %s1397_s24 = sshll.u32 %s387_s22, 3 }
  0x14   : > { %s1915_s17 = scalar_lea.hbm %s2186_s0, %s1398_s23  ;;  %s391_s30 = scalar_lea.vmem [#allocation2], %s1397_s24 }
  0x15   : > { %s398_s14 = sshll.u32 %s391_s30, 4  ;;  %p1919_p13 = pnand %p1578_p10, %p1891_p5  ;;  %s1923_s14 = int_to_ptr.vmem [resolvable:$true] %s398_s14 }
  0x16   : > { %s388_s15 = scalar_lea.sflag [#allocation3], %s387_s22  ;;  %s1666_s23 = scalar_lea.hbm %s1915_s17, 128 }
  0x17   : > { %p1667_p2 = scmp.ne.s32.totalorder %s1915_s17, %s1666_s23  ;;  %p1668_p3 = pneg %p1919_p13 }
  0x18   : > { %s1671_s16 = scalar_lea.hbm %s2186_s0, 256  ;;  %p1672_p5 = scmp.lt.u32.totalorder %s1915_s17, %s2186_s0 }
  0x19   : > { %p1669_p4 = pnand %p1668_p3, %p1667_p2  ;;  %p1673_p8 = scmp.lt.u32.totalorder %s1671_s16, %s1666_s23 }
  0x1a   : > { %p1675_p9 = scmp.lt.u32.totalorder %s1666_s23, %s1915_s17 }
  0x1b   : > { %p1670_p7 = pneg %p1669_p4  ;;  %p1674_p10 = por %p1673_p8, %p1672_p5 }
  0x1d   : > { %p1676_p0 = por %p1675_p9, %p1674_p10 }
  0x1f   : > { %p1677_p1 = pnand %p1676_p0, %p1670_p7 }
  0x21   : > { %1680 = shalt.err (!%p1677_p1)
}
  0x22   : > { %s1681_s22 = scalar_lea.vmem %s1923_s14, 128  ;;  %s1764_s18 = smov [#allocation2]  }
  0x23   : > { %p1682_p2 = scmp.ne.s32.totalorder %s1923_s14, %s1681_s22  ;;  %s1686_s24 = sshll.u32 %s1764_s18, 4  ;;  %s1687_s24 = int_to_ptr.vmem [resolvable:$false] %s1686_s24 }
  0x24   : > { %s1688_s27 = scalar_lea.vmem %s1687_s24, 256  ;;  %p1689_p11 = scmp.lt.s32.totalorder %s1923_s14, %s1687_s24 }
  0x25   : > { %p1684_p4 = pnand %p1682_p2, %p1668_p3  ;;  %p1690_p5 = scmp.lt.s32.totalorder %s1688_s27, %s1681_s22 }
  0x27   : > { %p1685_p12 = pneg %p1684_p4  ;;  %p1691_p8 = por %p1690_p5, %p1689_p11 }
  0x29   : > { %p1692_p9 = pnand %p1691_p8, %p1685_p12 }
  0x2b   : > { %1695 = shalt.err (!%p1692_p9)
}
  0x2c   : > { %1573 = dma.hbm_to_vmem [thread:$0]  (!%p1919_p13), %s1915_s17, 128, %s1923_s14, %s388_s15  }
  0x2d   : > { %p2214_p0 = scmp.lt.s32.totalorder %s1762_s28, 3  ;;  %p2215_p1 = scmp.ge.s32.totalorder %s1762_s28, 1 }
  0x2f   : > { %p404_p3 = pnand %p2215_p1, %p2214_p0 }
  0x30   : > { %s1957_s23 = sand.u32 (!%p404_p3), 1, %s1754_s26  }
  0x31   : > { %407 = sbr.rel (%p404_p3) target bundleno = 2200 (0x898), region = 72  ;;  %s1400_s16 = sshll.u32 (!%p404_p3), %s1957_s23, 3 }
  0x32   : > { %s410_s30 = scalar_lea.sflag (!%p404_p3), [#allocation3], %s1957_s23  ;;  %s413_s25 = scalar_lea.vmem (!%p404_p3), [#allocation2], %s1400_s16 }
  0x38   : > { %1741 = dma.done.wait (%p1895_p6), %s410_s30, 128  }
  0x39   : > { %1743 = vsyncadd (%p1895_p6), %s410_s30, 4294967168  ;;  %vm460_vm0 = vcmask 261120   ;;  %v1967_v0 = vld [vmem:[%s413_s25] sm:$0xff]  ;;  %v1765_v5 = vmov 0.0   ;;  %vm1766_vm1 = vmmov 0   ;;  %s1767_s14 = smov 96  }
  0x3a   : > { %v461_v1 = vsel %vm460_vm0, %v1967_v0, 0.0  ;;  %v466_v2 = vmul.f32 %v1967_v0, %v1967_v0  ;;  %v1628_v4 = vld [vmem:[%s2189_s3] sm:$0xff]   ;;  %1474 = vmatprep.subr.bf16.mxu0 %v1765_v5  ;;  %1478 = vmatprep.mubr.msk.bf16.mxu0 %vm1766_vm1, %v1765_v5  ;;  %v1629_v6 = vld [vmem:[%s2189_s3 + $0x8] sm:$0xff]   ;;  %s1768_s17 = smov 120   ;;  %s1769_s19 = smov 88   ;;  %vm565_vm2 = vcmask 64512  }
  0x3b   : > { %462 = vadd.xlane.f32.xlu0 %v461_v1  ;;  %1475 = vmatpush3.bf16.msra.mxu0 %v1628_v4  ;;  %v1402_v17 = vld [vmem:[%s2187_s1] ss:$0 sm:$0xff]  ;;  %s1770_s15 = smov 80   ;;  %s1771_s22 = smov 112   ;;  %vm628_vm3 = vcmask 1043456   ;;  %vm1017_vm4 = vcmask 130048  }
  0x3c   : > { %v467_v3 = vsel %vm460_vm0, %v466_v2, 0.0  ;;  %1494 = vmatprep.subr.bf16.mxu1 %v1765_v5  ;;  %1476 = vmatprep.subr.bf16.mxu0 %v1765_v5  ;;  %v1403_v19 = vld [vmem:[%s2188_s2] ss:$0 sm:$0xff]  ;;  %s1772_s18 = smov 72   ;;  %s1773_s24 = smov 104   ;;  %vm1019_vm5 = vcmask 195584  }
  0x3d   : > { %1496 = vmatprep.mubr.msk.bf16.mxu1 %vm1766_vm1, %v1765_v5  ;;  %v1404_v23 = vld [vmem:[%s2190_s4] ss:$0 sm:$0xff]  ;;  %s1774_s27 = smov 64   ;;  %s1775_s30 = smov 56  }
  0x3e   : > { %s1776_s25 = smov 48   ;;  %p2216_p11 = scmp.ne.s32.totalorder %s2211_s20, 0 }
  0x3f   : > { %468 = vadd.xlane.f32.xlu0 %v467_v3  ;;  %1477 = vmatpush3.bf16.msra.mxu0 %v1629_v6 }
  0x40   : > { %1482 = vmatprep.subr.bf16.mxu0 %v1765_v5 }
  0xc8   : > { %v463_v7 = vpop.xlane.xlu0 %462 }
  0xc9   : > { %v465_v8 = vmul.f32 0.03125, %v463_v7 }
  0xcb   : > { %v471_v10 = vmul.f32 %v465_v8, %v465_v8  ;;  %v473_v15 = vsub.f32 %v1967_v0, %v465_v8 }
  0xcc   : > { %v469_v9 = vpop.xlane.xlu0 %468 }
  0xcd   : > { %v470_v11 = vmul.f32 0.03125, %v469_v9 }
  0xcf   : > { %v472_v12 = vsub.f32 %v470_v11, %v471_v10 }
  0xd1   : > { %v474_v13 = vmax.f32 %v472_v12, 0.0 }
  0xd3   : > { %v475_v14 = vadd.f32 1e-05, %v474_v13 }
  0xd5   : > { %1642 = vrsqrt.f32 %v475_v14 }
  0xdf   : > { %v1643_v16 = vpop.eup %1642 }
  0xe0   : > { %v477_v18 = vmul.f32 %v1643_v16, %v473_v15 }
  0xe2   : > { %v484_v20 = vmul.f32 %v1402_v17, %v477_v18 }
  0xe4   : > { %v491_v21 = vadd.f32 %v1403_v19, %v484_v20 }
  0xe6   : > { %v492_v22 = vpack.c.bf16 %v491_v21, %v491_v21 }
  0xe8   : > { %1479 = vmatmul.mubr.msk.bf16.vlgmr.msra.gmra.mrb[0].mxu0 %vm460_vm0, %v492_v22 }
  0xe9   : > { %1484 = vmatprep.mubr.msk.bf16.mxu0 %vm1766_vm1, %v1765_v5 }
 0x1bb   : > { %v553_v24 = vpop.f32.mrb[0].mxu0 }
 0x1bc   : > { %v554_v25 = vadd.f32 %v1404_v23, %v553_v24  ;;  %v1480_v26 = vpop.f32.mrb[1].mxu0 }
 0x1bd   : > { %v556_v27 = vpop.f32.mrb[2].mxu0 }
 0x1be   : > { %v559_v28 = vmul.f32 0.35355338, %v554_v25  ;;  %v2001_v29 = vpack.c.bf16 %v554_v25, %v554_v25  ;;  %v1481_v30 = vpop.f32.mrb[3].mxu0 }
 0x1c0   : > { %v560_v31 = vpack.c.bf16 %v559_v28, %v559_v28  ;;  %563 = vrot.lane.b32.xlu1 %v2001_v29, %s1767_s14  ;;  %s1777_s14 = smov 40  }
 0x1c2   : > { %674 = vrot.lane.b32.xlu0 %v560_v31, %s1768_s17  ;;  %s1778_s17 = smov 8  }
 0x1c4   : > { %676 = vrot.lane.b32.xlu1 %v2001_v29, %s1769_s19 }
 0x1c8   : > { %786 = vrot.lane.b32.xlu1 %v2001_v29, %s1770_s15 }
 0x1cc   : > { %784 = vrot.lane.b32.xlu1 %v560_v31, %s1771_s22  ;;  %s1781_s22 = smov [#allocation5]  }
 0x1d0   : > { %896 = vrot.lane.b32.xlu1 %v2001_v29, %s1772_s18  ;;  %s1700_s18 = sshll.u32 %s1781_s22, 4  ;;  %s1701_s18 = int_to_ptr.vmem [resolvable:$false] %s1700_s18 }
 0x1d4   : > { %894 = vrot.lane.b32.xlu1 %v560_v31, %s1773_s24  ;;  %s1779_s24 = smov 16  }
 0x232   : > { %v564_v32 = vpop.permute.xlu1 %563 }
 0x233   : > { %v570_v33 = vsel %vm565_vm2, %v564_v32, 0 }
 0x234   : > { %1483 = vmatpush3.bf16.xpose.msra.mxu0 %v570_v33  ;;  %v675_v37 = vpop.permute.xlu0 %674 }
 0x235   : > { %1488 = vmatprep.subr.bf16.mxu0 %v1765_v5 }
 0x236   : > { %v677_v34 = vpop.permute.xlu1 %676 }
 0x237   : > { %v682_v35 = vsel %vm565_vm2, %v677_v34, 0 }
 0x238   : > { %1495 = vmatpush3.bf16.xpose.msra.mxu1 %v682_v35 }
 0x239   : > { %1506 = vmatprep.subr.bf16.mxu1 %v1765_v5 }
 0x23a   : > { %v787_v36 = vpop.permute.xlu1 %786 }
 0x23b   : > { %1485 = vmatmul.mubr.msk.bf16.vlgmr.msra.gmra.mrb[4].mxu0 %vm565_vm2, %v560_v31  ;;  %v792_v39 = vsel %vm565_vm2, %v787_v36, 0 }
 0x23c   : > { %1490 = vmatprep.mubr.msk.bf16.mxu0 %vm1766_vm1, %v1765_v5 }
 0x23e   : > { %v785_v38 = vpop.permute.xlu1 %784 }
 0x23f   : > { %1497 = vmatmul.mubr.msk.bf16.vlgmr.msra.gmra.mrb[0].mxu1 %vm565_vm2, %v675_v37 }
 0x240   : > { %1507 = vmatpush3.bf16.xpose.msra.mxu1 %v792_v39  ;;  %1508 = vmatprep.mubr.msk.bf16.mxu1 %vm1766_vm1, %v1765_v5 }
 0x241   : > { %1518 = vmatprep.subr.bf16.mxu1 %v1765_v5 }
 0x242   : > { %v897_v40 = vpop.permute.xlu1 %896 }
 0x243   : > { %v902_v41 = vsel %vm565_vm2, %v897_v40, 0 }
 0x246   : > { %v895_v42 = vpop.permute.xlu1 %894 }
 0x247   : > { %1509 = vmatmul.mubr.msk.bf16.vlgmr.msra.gmra.mrb[4].mxu1 %vm565_vm2, %v785_v38 }
 0x248   : > { %1519 = vmatpush3.bf16.xpose.msra.mxu1 %v902_v41  ;;  %1520 = vmatprep.mubr.msk.bf16.mxu1 %vm1766_vm1, %v1765_v5 }
 0x249   : > { %1530 = vmatprep.subr.bf16.mxu1 %v1765_v5 }
 0x24f   : > { %1521 = vmatmul.mubr.msk.bf16.vlgmr.msra.gmra.mrb[8].mxu1 %vm565_vm2, %v895_v42 }
 0x250   : > { %1534 = vmatprep.mubr.msk.bf16.mxu1 %vm1766_vm1, %v1765_v5 }
 0x30e   : > { %v606_v43 = vpop.f32.mrb[4].mxu0 }
 0x30f   : > { %v1486_v44 = vpop.f32.mrb[5].mxu0  ;;  %v612_v45 = vsel %vm565_vm2, %v606_v43, -inf }
 0x310   : > { %613 = vmax.xlane.f32.xlu1 %v612_v45  ;;  %v609_v46 = vpop.f32.mrb[6].mxu0  ;;  %v1630_v45 = vld [vmem:[%s2191_s5] sm:$0xff]  }
 0x311   : > { %v1487_v47 = vpop.f32.mrb[7].mxu0  ;;  %1531 = vmatpush3.bf16.msra.mxu1 %v1630_v45 }
 0x312   : > { %v718_v48 = vpop.f32.mrb[0].mxu1  ;;  %1532 = vmatprep.subr.bf16.mxu1 %v1765_v5  ;;  %v1631_v47 = vld [vmem:[%s2191_s5 + $0x8] sm:$0xff]  }
 0x313   : > { %v1498_v49 = vpop.f32.mrb[1].mxu1  ;;  %v724_v50 = vsel %vm565_vm2, %v718_v48, -inf }
 0x314   : > { %725 = vmax.xlane.f32.xlu0 %v724_v50  ;;  %v721_v51 = vpop.f32.mrb[2].mxu1 }
 0x315   : > { %v1499_v52 = vpop.f32.mrb[3].mxu1  ;;  %1533 = vmatpush3.bf16.msra.mxu1 %v1631_v47 }
 0x316   : > { %1546 = vmatprep.subr.bf16.mxu1 %v1765_v5 }
 0x31a   : > { %v828_v53 = vpop.f32.mrb[4].mxu1 }
 0x31b   : > { %v1510_v54 = vpop.f32.mrb[5].mxu1  ;;  %v834_v62 = vsel %vm565_vm2, %v828_v53, -inf }
 0x31c   : > { %v831_v55 = vpop.f32.mrb[6].mxu1 }
 0x31d   : > { %v1511_v56 = vpop.f32.mrb[7].mxu1 }
 0x321   : > { %623 = vrot.lane.b32.xlu1 %v2001_v29, %s1774_s27  ;;  %s1780_s27 = smov 24  }
 0x322   : > { %v938_v57 = vpop.f32.mrb[8].mxu1 }
 0x323   : > { %v1522_v58 = vpop.f32.mrb[9].mxu1  ;;  %v944_v59 = vsel %vm565_vm2, %v938_v57, -inf }
 0x324   : > { %945 = vmax.xlane.f32.xlu0 %v944_v59  ;;  %v941_v60 = vpop.f32.mrb[10].mxu1 }
 0x325   : > { %v1523_v61 = vpop.f32.mrb[11].mxu1 }
 0x33a   : > { %735 = vrot.lane.b32.xlu0 %v2001_v29, %s1775_s30  ;;  %s1437_s30 = sshll.u32 %s1873_s29, 7  ;;  %s1311_s29 = scalar_lea.sflag [#allocation4], %s1957_s23 }
 0x33b   : > { %s2141_s15 = scalar_lea.hbm %s2199_s13, %s1437_s30 }
 0x345   : > { %835 = vmax.xlane.f32.xlu1 %v834_v62 }
 0x356   : > { %845 = vrot.lane.b32.xlu1 %v2001_v29, %s1776_s25  ;;  %s455_s25 = scalar_lea.vmem [#allocation5], %s1400_s16 }
 0x35a   : > { %955 = vrot.lane.b32.xlu1 %v2001_v29, %s1777_s14  ;;  %s1324_s14 = sshll.u32 %s455_s25, 4  ;;  %s2143_s14 = int_to_ptr.vmem [resolvable:$true] %s1324_s14 }
 0x35b   : > { %s1696_s16 = scalar_lea.vmem %s2143_s14, 128  ;;  %p1703_p7 = scmp.lt.s32.totalorder %s2143_s14, %s1701_s18 }
 0x35c   : > { %p1697_p6 = scmp.ne.s32.totalorder %s2143_s14, %s1696_s16 }
 0x35e   : > { %p1698_p12 = pnand %p1697_p6, %p2216_p11 }
 0x360   : > { %p1699_p13 = pneg %p1698_p12 }
 0x39d   : > { %v614_v63 = vpop.xlane.xlu1 %613 }
 0x39e   : > { %v615_v1 = vsub.f32 %v606_v43, %v614_v63 }
 0x3a0   : > { %v616_v2 = vmul.f32 1.442695, %v615_v1 }
 0x3a1   : > { %v726_v3 = vpop.xlane.xlu0 %725  ;;  %v624_v4 = vpop.permute.xlu1 %623 }
 0x3a2   : > { %1644 = vpow2.f32 %v616_v2  ;;  %v727_v6 = vsub.f32 %v718_v48, %v726_v3  ;;  %v630_v7 = vsel %vm628_vm3, %v624_v4, 0 }
 0x3a3   : > { %1489 = vmatpush3.bf16.msra.mxu0 %v630_v7 }
 0x3a4   : > { %v728_v8 = vmul.f32 1.442695, %v727_v6  ;;  %1500 = vmatprep.subr.bf16.mxu0 %v1765_v5 }
 0x3a6   : > { %1646 = vpow2.f32 %v728_v8  ;;  %v1416_v8 = vld [vmem:[%s2192_s6] ss:$0 sm:$0xff] }
 0x3ac   : > { %v1645_v9 = vpop.eup %1644 }
 0x3ad   : > { %v622_v10 = vpack.c.bf16 %v1645_v9, %v1645_v9  ;;  %v618_v21 = vsel %vm565_vm2, %v1645_v9, 0.0 }
 0x3af   : > { %1491 = vmatmul.mubr.msk.bf16.vlgmr.msra.gmra.mrb[8].mxu0 %vm565_vm2, %v622_v10 }
 0x3b0   : > { %v1647_v11 = vpop.eup %1646  ;;  %1502 = vmatprep.mubr.msk.bf16.mxu0 %vm1766_vm1, %v1765_v5 }
 0x3b1   : > { %v946_v12 = vpop.xlane.xlu0 %945  ;;  %v730_v13 = vsel %vm565_vm2, %v1647_v11, 0.0  ;;  %v734_v18 = vpack.c.bf16 %v1647_v11, %v1647_v11 }
 0x3b2   : > { %v947_v14 = vsub.f32 %v938_v57, %v946_v12  ;;  %731 = vadd.xlane.f32.xlu0 %v730_v13 }
 0x3b4   : > { %v948_v15 = vmul.f32 1.442695, %v947_v14 }
 0x3b5   : > { %v736_v16 = vpop.permute.xlu0 %735 }
 0x3b6   : > { %1648 = vpow2.f32 %v948_v15  ;;  %v741_v17 = vsel %vm628_vm3, %v736_v16, 0 }
 0x3b7   : > { %1501 = vmatpush3.bf16.msra.mxu0 %v741_v17 }
 0x3b8   : > { %1512 = vmatprep.subr.bf16.mxu0 %v1765_v5 }
 0x3ba   : > { %1503 = vmatmul.mubr.msk.bf16.vlgmr.msra.gmra.mrb[12].mxu0 %vm565_vm2, %v734_v18  ;;  %v1632_v18 = vld [vmem:[%s2195_s9] sm:$0xff]  }
 0x3bb   : > { %1514 = vmatprep.mubr.msk.bf16.mxu0 %vm1766_vm1, %v1765_v5 }
 0x3c0   : > { %v1649_v19 = vpop.eup %1648 }
 0x3c1   : > { %v950_v20 = vsel %vm565_vm2, %v1649_v19, 0.0  ;;  %v954_v32 = vpack.c.bf16 %v1649_v19, %v1649_v19 }
 0x3c2   : > { %951 = vadd.xlane.f32.xlu0 %v950_v20 }
 0x3c6   : > { %619 = vadd.xlane.f32.xlu0 %v618_v21 }
 0x3d2   : > { %v836_v22 = vpop.xlane.xlu1 %835 }
 0x3d3   : > { %v837_v23 = vsub.f32 %v828_v53, %v836_v22 }
 0x3d5   : > { %v838_v24 = vmul.f32 1.442695, %v837_v23 }
 0x3d6   : > { %v846_v25 = vpop.permute.xlu1 %845 }
 0x3d7   : > { %1650 = vpow2.f32 %v838_v24  ;;  %v851_v26 = vsel %vm628_vm3, %v846_v25, 0 }
 0x3d8   : > { %1513 = vmatpush3.bf16.msra.mxu0 %v851_v26 }
 0x3d9   : > { %1524 = vmatprep.subr.bf16.mxu0 %v1765_v5 }
 0x3da   : > { %v956_v28 = vpop.permute.xlu1 %955 }
 0x3db   : > { %v961_v31 = vsel %vm628_vm3, %v956_v28, 0 }
 0x3e1   : > { %v1651_v27 = vpop.eup %1650 }
 0x3e2   : > { %v840_v29 = vsel %vm565_vm2, %v1651_v27, 0.0  ;;  %v844_v30 = vpack.c.bf16 %v1651_v27, %v1651_v27 }
 0x3e3   : > { %841 = vadd.xlane.f32.xlu1 %v840_v29  ;;  %v1420_v29 = vld [vmem:[%s2193_s7] ss:$0 sm:$0xff] }
 0x3e4   : > { %1515 = vmatmul.mubr.msk.bf16.vlgmr.msra.gmra.mrb[16].mxu0 %vm565_vm2, %v844_v30 }
 0x3e5   : > { %1525 = vmatpush3.bf16.msra.mxu0 %v961_v31  ;;  %1526 = vmatprep.mubr.msk.bf16.mxu0 %vm1766_vm1, %v1765_v5  ;;  %v1421_v31 = vld [vmem:[%s2194_s8] ss:$0 sm:$0xff] }
 0x3e6   : > { %1538 = vmatprep.subr.bf16.mxu0 %v1765_v5 }
 0x3ec   : > { %1527 = vmatmul.mubr.msk.bf16.vlgmr.msra.gmra.mrb[20].mxu0 %vm565_vm2, %v954_v32 }
 0x3ed   : > { %1542 = vmatprep.mubr.msk.bf16.mxu0 %vm1766_vm1, %v1765_v5  ;;  %1539 = vmatpush3.bf16.msra.mxu0 %v1632_v18 }
 0x3ee   : > { %1540 = vmatprep.subr.bf16.mxu0 %v1765_v5 }
 0x43f   : > { %v732_v33 = vpop.xlane.xlu0 %731 }
 0x440   : > { %1652 = vrcp.f32 %v732_v33 }
 0x44a   : > { %v1653_v38 = vpop.eup %1652 }
 0x44f   : > { %v952_v46 = vpop.xlane.xlu0 %951 }
 0x453   : > { %v620_v60 = vpop.xlane.xlu0 %619 }
 0x470   : > { %v842_v44 = vpop.xlane.xlu1 %841 }
 0x471   : > { %1654 = vrcp.f32 %v842_v44 }
 0x472   : > { %1656 = vrcp.f32 %v952_v46 }
 0x473   : > { %1658 = vrcp.f32 %v620_v60 }
 0x47b   : > { %v1655_v48 = vpop.eup %1654 }
 0x47c   : > { %v1657_v54 = vpop.eup %1656 }
 0x47d   : > { %v1659_v61 = vpop.eup %1658 }
 0x482   : > { %v666_v34 = vpop.f32.mrb[8].mxu0 }
 0x483   : > { %v1492_v35 = vpop.f32.mrb[9].mxu0  ;;  %v672_v63 = vmul.f32 %v1659_v61, %v666_v34 }
 0x484   : > { %v669_v36 = vpop.f32.mrb[10].mxu0  ;;  %v1634_v35 = vld [vmem:[%s2197_s11] sm:$0xff]  }
 0x485   : > { %v1493_v37 = vpop.f32.mrb[11].mxu0  ;;  %v1635_v36 = vld [vmem:[%s2197_s11 + $0x8] sm:$0xff]  }
 0x486   : > { %v1636_v37 = vld [vmem:[%s2197_s11 + $0x10] sm:$0xff]  }
 0x48d   : > { %v777_v39 = vpop.f32.mrb[12].mxu0 }
 0x48e   : > { %v783_v40 = vmul.f32 %v1653_v38, %v777_v39  ;;  %v1504_v41 = vpop.f32.mrb[13].mxu0  ;;  %v1637_v38 = vld [vmem:[%s2197_s11 + $0x18] sm:$0xff]   ;;  %v1638_v39 = vld [vmem:[%s2197_s11 + $0x20] sm:$0xff]  }
 0x48f   : > { %v780_v42 = vpop.f32.mrb[14].mxu0  ;;  %v1640_v41 = vld [vmem:[%s2197_s11 + $0x30] sm:$0xff]  }
 0x490   : > { %1005 = vrot.lane.b32.xlu1 %v783_v40, %s1778_s17  ;;  %v1505_v43 = vpop.f32.mrb[15].mxu0  ;;  %v1639_v40 = vld [vmem:[%s2197_s11 + $0x28] sm:$0xff]   ;;  %v1641_v42 = vld [vmem:[%s2197_s11 + $0x38] sm:$0xff]  }
 0x491   : > { %v1422_v43 = vld [vmem:[%s2196_s10] ss:$0 sm:$0xff] }
 0x4b7   : > { %v887_v49 = vpop.f32.mrb[16].mxu0 }
 0x4b8   : > { %v893_v50 = vmul.f32 %v1655_v48, %v887_v49  ;;  %v1516_v51 = vpop.f32.mrb[17].mxu0 }
 0x4b9   : > { %v890_v52 = vpop.f32.mrb[18].mxu0 }
 0x4ba   : > { %1009 = vrot.lane.b32.xlu0 %v893_v50, %s1779_s24  ;;  %v1517_v53 = vpop.f32.mrb[19].mxu0  ;;  %s1702_s24 = scalar_lea.vmem %s1701_s18, 256 }
 0x4bb   : > { %p1704_p10 = scmp.lt.s32.totalorder %s1702_s24, %s1696_s16 }
 0x4bd   : > { %p1705_p2 = por %p1704_p10, %p1703_p7 }
 0x4bf   : > { %v997_v55 = vpop.f32.mrb[20].mxu0  ;;  %p1706_p4 = pnand %p1705_p2, %p1699_p13 }
 0x4c0   : > { %v1003_v56 = vmul.f32 %v1657_v54, %v997_v55  ;;  %v1528_v57 = vpop.f32.mrb[21].mxu0  ;;  %v1427_v55 = vld [vmem:[%s2198_s12] ss:$0 sm:$0xff] }
 0x4c1   : > { %v1000_v58 = vpop.f32.mrb[22].mxu0 }
 0x4c2   : > { %1013 = vrot.lane.b32.xlu1 %v1003_v56, %s1780_s27  ;;  %v1529_v59 = vpop.f32.mrb[23].mxu0 }
 0x502   : > { %v1006_v62 = vpop.permute.xlu1 %1005 }
 0x503   : > { %v1016_v2 = vsel %vm565_vm2, %v672_v63, %v1006_v62 }
 0x52c   : > { %v1010_v1 = vpop.permute.xlu0 %1009 }
 0x52d   : > { %v1018_v3 = vsel %vm1017_vm4, %v1016_v2, %v1010_v1 }
 0x534   : > { %v1014_v4 = vpop.permute.xlu1 %1013 }
 0x535   : > { %v1020_v6 = vsel %vm1019_vm5, %v1018_v3, %v1014_v4 }
 0x536   : > { %v1021_v7 = vpack.c.bf16 %v1020_v6, %v1020_v6 }
 0x538   : > { %1535 = vmatmul.mubr.msk.bf16.vlgmr.msra.gmra.mrb[12].mxu1 %vm460_vm0, %v1021_v7 }
 0x539   : > { %1562 = vmatprep.mubr.msk.bf16.mxu1 %vm1766_vm1, %v1765_v5  ;;  %1547 = vmatpush3.bf16.msra.mxu1 %v1634_v35 }
 0x53a   : > { %1548 = vmatprep.subr.bf16.mxu1 %v1765_v5 }
 0x53d   : > { %1549 = vmatpush3.bf16.msra.mxu1 %v1635_v36 }
 0x53e   : > { %1550 = vmatprep.subr.bf16.mxu1 %v1765_v5 }
 0x541   : > { %1551 = vmatpush3.bf16.msra.mxu1 %v1636_v37 }
 0x542   : > { %1552 = vmatprep.subr.bf16.mxu1 %v1765_v5 }
 0x545   : > { %1553 = vmatpush3.bf16.msra.mxu1 %v1637_v38 }
 0x546   : > { %1554 = vmatprep.subr.bf16.mxu1 %v1765_v5 }
 0x549   : > { %1555 = vmatpush3.bf16.msra.mxu1 %v1638_v39 }
 0x54a   : > { %1556 = vmatprep.subr.bf16.mxu1 %v1765_v5 }
 0x54d   : > { %1557 = vmatpush3.bf16.msra.mxu1 %v1639_v40 }
 0x54e   : > { %1558 = vmatprep.subr.bf16.mxu1 %v1765_v5 }
 0x551   : > { %1559 = vmatpush3.bf16.msra.mxu1 %v1640_v41 }
 0x552   : > { %1560 = vmatprep.subr.bf16.mxu1 %v1765_v5 }
 0x555   : > { %1561 = vmatpush3.bf16.msra.mxu1 %v1641_v42 }
 0x60b   : > { %v1082_v9 = vpop.f32.mrb[12].mxu1 }
 0x60c   : > { %v1083_v10 = vadd.f32 %v1416_v8, %v1082_v9  ;;  %v1536_v11 = vpop.f32.mrb[13].mxu1 }
 0x60d   : > { %v1085_v12 = vpop.f32.mrb[14].mxu1 }
 0x60e   : > { %v2075_v13 = vadd.f32 %v1083_v10, %v1967_v0  ;;  %v1537_v14 = vpop.f32.mrb[15].mxu1  ;;  %v1633_v0 = vld [vmem:[%s2195_s9 + $0x8] sm:$0xff]  }
 0x60f   : > { %1541 = vmatpush3.bf16.msra.mxu0 %v1633_v0 }
 0x610   : > { %v1091_v15 = vsel %vm460_vm0, %v2075_v13, 0.0  ;;  %v1095_v16 = vmul.f32 %v2075_v13, %v2075_v13 }
 0x611   : > { %1092 = vadd.xlane.f32.xlu1 %v1091_v15 }
 0x612   : > { %v1096_v17 = vsel %vm460_vm0, %v1095_v16, 0.0 }
 0x613   : > { %1097 = vadd.xlane.f32.xlu0 %v1096_v17 }
 0x69e   : > { %v1093_v19 = vpop.xlane.xlu1 %1092 }
 0x69f   : > { %v1094_v20 = vmul.f32 0.03125, %v1093_v19 }
 0x6a0   : > { %v1098_v21 = vpop.xlane.xlu0 %1097 }
 0x6a1   : > { %v1100_v22 = vmul.f32 %v1094_v20, %v1094_v20  ;;  %v1099_v23 = vmul.f32 0.03125, %v1098_v21  ;;  %v1102_v27 = vsub.f32 %v2075_v13, %v1094_v20 }
 0x6a3   : > { %v1101_v24 = vsub.f32 %v1099_v23, %v1100_v22 }
 0x6a5   : > { %v1103_v25 = vmax.f32 %v1101_v24, 0.0 }
 0x6a7   : > { %v1104_v26 = vadd.f32 1e-05, %v1103_v25 }
 0x6a9   : > { %1660 = vrsqrt.f32 %v1104_v26 }
 0x6b3   : > { %v1661_v28 = vpop.eup %1660 }
 0x6b4   : > { %v1106_v30 = vmul.f32 %v1661_v28, %v1102_v27 }
 0x6b6   : > { %v1113_v32 = vmul.f32 %v1420_v29, %v1106_v30 }
 0x6b8   : > { %v1120_v33 = vadd.f32 %v1421_v31, %v1113_v32 }
 0x6ba   : > { %v1121_v34 = vpack.c.bf16 %v1120_v33, %v1120_v33 }
 0x6bc   : > { %1543 = vmatmul.mubr.msk.bf16.vlgmr.msra.gmra.mrb[24].mxu0 %vm460_vm0, %v1121_v34 }
 0x78f   : > { %v1182_v44 = vpop.f32.mrb[24].mxu0 }
 0x790   : > { %v1183_v45 = vadd.f32 %v1422_v43, %v1182_v44  ;;  %v1544_v46 = vpop.f32.mrb[25].mxu0 }
 0x791   : > { %v1185_v47 = vpop.f32.mrb[26].mxu0 }
 0x792   : > { %v1426_v48 = vmul.f32 -1.702, %v1183_v45  ;;  %v1545_v49 = vpop.f32.mrb[27].mxu0 }
 0x794   : > { %v1190_v50 = vmul.f32 1.442695, %v1426_v48 }
 0x796   : > { %1662 = vpow2.f32 %v1190_v50 }
 0x7a0   : > { %v1663_v5 = vpop.eup %1662 }
 0x7a1   : > { %v1192_v51 = vadd.f32 1.0, %v1663_v5 }
 0x7a3   : > { %1664 = vrcp.f32 %v1192_v51 }
 0x7ad   : > { %v1665_v52 = vpop.eup %1664 }
 0x7ae   : > { %v1195_v53 = vmul.f32 %v1665_v52, %v1183_v45 }
 0x7b0   : > { %v1196_v54 = vpack.c.bf16 %v1195_v53, %v1195_v53 }
 0x7b2   : > { %1563 = vmatmul.mubr.bf16.vlgmr.msra.gmra.mrb[16].mxu1 %v1196_v54 }
 0x885   : > { %v1302_v56 = vpop.f32.mrb[16].mxu1 }
 0x886   : > { %v1303_v57 = vadd.f32 %v1427_v55, %v1302_v56  ;;  %v1564_v58 = vpop.f32.mrb[17].mxu1 }
 0x887   : > { %v1305_v59 = vpop.f32.mrb[18].mxu1 }
 0x888   : > { %v1308_v60 = vadd.f32 %v1303_v57, %v2075_v13  ;;  %v1565_v61 = vpop.f32.mrb[19].mxu1 }
 0x88a   : > { %1309 = vst.msk [vmem:[%s455_s25] sm:$0xff] %vm460_vm0, %v1308_v60 }
 0x88b   : > { %1709 = shalt.err (!%p1706_p4)
}
 0x88c   : > { %s1710_s23 = scalar_lea.hbm %s2141_s15, 128  ;;  %s1714_s25 = scalar_lea.hbm %s2199_s13, 256 }
 0x88d   : > { %p1711_p5 = scmp.ne.s32.totalorder %s2141_s15, %s1710_s23  ;;  %p1715_p0 = scmp.lt.u32.totalorder %s2141_s15, %s2199_s13 }
 0x88e   : > { %p1716_p1 = scmp.lt.u32.totalorder %s1714_s25, %s1710_s23  ;;  %p1718_p6 = scmp.lt.u32.totalorder %s1710_s23, %s2141_s15 }
 0x88f   : > { %p1712_p8 = pnand %p1711_p5, %p2216_p11 }
 0x890   : > { %p1717_p3 = por %p1716_p1, %p1715_p0 }
 0x891   : > { %p1713_p9 = pneg %p1712_p8 }
 0x892   : > { %p1719_p12 = por %p1718_p6, %p1717_p3 }
 0x894   : > { %p1720_p13 = pnand %p1719_p12, %p1713_p9 }
 0x896   : > { %1723 = shalt.err (!%p1720_p13)
}
 0x897   : > { %1568 = dma.vmem_to_hbm [thread:$0]  (%p2216_p11), %s2143_s14, 128, %s2141_s15, %s1311_s29  }
 0x898 PF: > { %s2217_s16 = sld [smem:[#allocation8_spill]]  ;;  %p2218_p7 = scmp.ne.s32.totalorder %s2212_s21, 0 }
 0x899   : > { %p2219_p10 = scmp.ge.s32.totalorder %s1762_s28, 2 }
 0x89b   : > { %p1575_p2 = pnand %p2219_p10, %p2218_p7 }
 0x89e   : > { %s1336_s22 = sand.u32 1, %s2217_s16  }
 0x89f   : > { %s1337_s18 = scalar_lea.sflag [#allocation4], %s1336_s22 }
 0x8a0   : > { %1745 = dma.done.wait (!%p1575_p2), %s1337_s18, 128  }
 0x8a1   : > { %1747 = vsyncadd (!%p1575_p2), %s1337_s18, 4294967168  ;;  %s2220_s28 = sld [smem:[#allocation10_spill]]  ;;  %s2221_s24 = sld [smem:[#allocation9_spill]] }
 0x8a2   : > { %s2222_s27 = sld [smem:[#allocation11_spill]]  ;;  %s2223_s25 = smov %s1754_s26 }
 0x8a7   : > { %p26_p4 = scmp.ge.s32.totalorder %s2220_s28, 4   ;;  %s2224_s26 = smov %s2221_s24 }
 0x8a9   :  { %28 = sbr.rel (!%p26_p4) target bundleno = 5 (0x5), region = 117 }
 0x8b0   :  { %1342 = vsyncpa [#allocation3], 1 }
 0x8b1   :  { %1344 = vsyncpa [#allocation3 + $0x1], 1 }
 0x8b2   :  { %1345 = vsyncpa [#allocation4], 1 }
 0x8b3   :  { %1347 = vsyncpa [#allocation4 + $0x1], 1 }

</bundles_post_ra>
